<compile_context>
chip_gen: v7x
topology: tpu7x:2x2x1
jax: 0.10.0
libtpu: 0.0.40
codegen_flags: <defaults>
</compile_context>

<pallas_src>
import functools

import jax
import jax.numpy as jnp
import numpy as np
from jax.experimental import pallas as pl
from jax.experimental.pallas import tpu as pltpu

_UNROLL_G = 32  # unroll the per-group loop up to this many groups


# ---------------------------------------------------------------------------
# Small helpers (trace-time Python + in-kernel math shared by all paths).
# ---------------------------------------------------------------------------
def _vmem_cap_bytes():
    """~75% of physical VMEM per TensorCore, bounded to [32, 96] MiB."""
    try:
        cap = int(pltpu.get_tpu_info().vmem_capacity_bytes)
    except Exception:  # not resolvable -> assume the smallest (v7x: 64 MiB/TC)
        cap = 64 * 2**20
    return int(max(32 * 2**20, min(cap * 3 // 4, 96 * 2**20)))


def _divisor_blocks(N):
    cands = [d for d in range(8, N + 1, 8) if N % d == 0]
    return cands if cands else [N]


def _pick_bn(N, row_bytes, budget, want_multi=False):
    """Largest multiple-of-8 divisor of N whose block fits the budget."""
    cands = _divisor_blocks(N)
    if want_multi and N >= 16:
        small = [d for d in cands if d <= N // 2]  # >= 2 grid steps (v7x dual-TC)
        if small:
            cands = small
    fitting = [d for d in cands if d * row_bytes <= budget]
    return max(fitting) if fitting else None


def _pick_col_tile(cHW, CHW, target=512):
    """Column-tile width for the stats reduction (never straddles a feature)."""
    if cHW % 128 == 0:
        if cHW <= target:
            return cHW
        for cand in range(target, 127, -128):
            if cHW % cand == 0:
                return cand
        return cHW
    return CHW  # unaligned feature width -> single tile spanning everything


def _group_sum_sq(read_g, G, M, cols):
    """Streamed single-pass sum / sum-of-squares over the group axis."""
    zero = jnp.zeros((M, cols), jnp.float32)
    if G <= _UNROLL_G:
        s1, s2 = zero, zero
        for g in range(G):
            xg = read_g(g)
            s1 = s1 + xg
            s2 = s2 + xg * xg
        return s1, s2

    def body(g, carry):
        s1, s2 = carry
        xg = read_g(g)
        return s1 + xg, s2 + xg * xg

    return jax.lax.fori_loop(0, G, body, (zero, zero))


def _std_rows(s1, s2, inv_G):
    mu = s1 * inv_G
    var = jnp.maximum(s2 * inv_G - mu * mu, 0.0)  # clamp: single-pass cancellation
    return jnp.sqrt(var + 1e-8)


def _feature_means(std, M, F, cHW, inv_cHW):
    return [jnp.sum(std[:, f * cHW:(f + 1) * cHW], axis=-1, keepdims=True) * inv_cHW
            for f in range(F)]


def _broadcast_tail(cols, rows, HW):
    parts = [jnp.broadcast_to(c, (rows, HW)) for c in cols]
    return parts[0] if len(parts) == 1 else jnp.concatenate(parts, axis=-1)


# ---------------------------------------------------------------------------
# Path A: fused kernel -- x resident in VMEM, stats at step 0, blocked copy.
# ---------------------------------------------------------------------------
def _fused_kernel(x_ref, o_ref, sb_ref, *, G, M, F, HW, cHW, CHW, bn,
                  inv_G, inv_cHW):
    # x_ref : (N, C*H*W)        full x, resident in VMEM (DMA'd from HBM once)
    # o_ref : (bn, (C+F)*H*W)   lane-dense output row block
    # sb_ref: (N, F*H*W) f32    per-sample std rows, pre-broadcast over H*W
    i = pl.program_id(0)

    @pl.when(i == 0)
    def _compute_stats():
        def read_g(g):
            return x_ref[pl.ds(g * M, M), :].astype(jnp.float32)

        s1, s2 = _group_sum_sq(read_g, G, M, CHW)
        std = _std_rows(s1, s2, inv_G)                               # (M, CHW)
        srow = _broadcast_tail(_feature_means(std, M, F, cHW, inv_cHW), M, HW)

        if G <= _UNROLL_G:
            for g in range(G):
                sb_ref[pl.ds(g * M, M), :] = srow
        else:
            def store(g, _):
                sb_ref[pl.ds(g * M, M), :] = srow
                return 0
            jax.lax.fori_loop(0, G, store, 0)

    r0 = pl.multiple_of(i * bn, bn)
    o_ref[:, :CHW] = x_ref[pl.ds(r0, bn), :]                  # native-dtype copy
    o_ref[:, CHW:] = sb_ref[pl.ds(r0, bn), :].astype(o_ref.dtype)


# ---------------------------------------------------------------------------
# Path B, kernel 1: column-tiled std statistics (two partial halves -> 2 TCs).
# ---------------------------------------------------------------------------
def _stats_kernel(x_ref, s_ref, acc_ref, *, G, M, F, cHW, tiles_per_f,
                  tiles_per_part, per_f_in_kernel, inv_G, inv_cHW):
    # x_ref  : (G, M, tc)   column tile of x viewed as (G, M, C*H*W)
    # s_ref  : (1, M, F)    per-part partial feature means (float32)
    # acc_ref: (M, F)       float32 accumulator scratch
    p = pl.program_id(0)
    j = pl.program_id(1)

    @pl.when(j == 0)
    def _init():
        acc_ref[...] = jnp.zeros_like(acc_ref)

    tc = x_ref.shape[-1]
    s1, s2 = _group_sum_sq(lambda g: x_ref[g].astype(jnp.float32), G, M, tc)
    std = _std_rows(s1, s2, inv_G)                                   # (M, tc)

    if per_f_in_kernel:
        cols = _feature_means(std, M, F, cHW, inv_cHW)
        acc_ref[...] += cols[0] if F == 1 else jnp.concatenate(cols, axis=-1)
    else:
        partial = jnp.sum(std, axis=-1, keepdims=True) * inv_cHW     # (M, 1)
        f_idx = (p * tiles_per_part + j) // tiles_per_f
        fcol = jax.lax.broadcasted_iota(jnp.int32, (M, F), 1)
        acc_ref[...] += jnp.where(fcol == f_idx, partial, 0.0)

    @pl.when(j == pl.num_programs(1) - 1)
    def _finalize():
        s_ref[...] = acc_ref[...][None]


# ---------------------------------------------------------------------------
# Path B, kernel 2: fused copy + std-channel concat (lane-dense, parallel).
# ---------------------------------------------------------------------------
def _concat_kernel(x_ref, oh_ref, s_ref, o_ref, *, M, F, HW, CHW, bn):
    # x_ref : (bn, C*H*W)   native-dtype pass-through block
    # oh_ref: (bn, M) f32   one-hot "sample n -> group slot n % M" rows
    # s_ref : (M, F)  f32   per-slot std stats, resident across the grid
    # o_ref : (bn, (C+F)*H*W)
    o_ref[:, :CHW] = x_ref[...]
    if M == 1:
        sel = jnp.broadcast_to(s_ref[...].reshape(1, F), (bn, F))
    else:
        sel = jnp.dot(oh_ref[...], s_ref[...],
                      preferred_element_type=jnp.float32)            # (bn, F)
    tail = _broadcast_tail([sel[:, f:f + 1] for f in range(F)], bn, HW)
    o_ref[:, CHW:] = tail.astype(o_ref.dtype)


def _stats_pallas(x, G, M, F, cHW, CHW, inv_G, inv_cHW, cap):
    """Column-tiled stats reduction -> (M, F) float32."""
    tc = _pick_col_tile(cHW, CHW)
    single_tile = (tc == CHW)
    if single_tile:
        num_tiles, tiles_per_f = 1, 1
    else:
        num_tiles = CHW // tc
        tiles_per_f = cHW // tc
    parts = 2 if (num_tiles % 2 == 0 and num_tiles >= 2) else 1
    tiles_per_part = num_tiles // parts

    xg = x.reshape(G, M, CHW)
    stats_out = pl.pallas_call(
        functools.partial(
            _stats_kernel, G=G, M=M, F=F, cHW=cHW, tiles_per_f=tiles_per_f,
            tiles_per_part=tiles_per_part, per_f_in_kernel=single_tile,
            inv_G=inv_G, inv_cHW=inv_cHW),
        out_shape=jax.ShapeDtypeStruct((parts, M, F), jnp.float32),
        grid=(parts, tiles_per_part),
        in_specs=[pl.BlockSpec((G, M, tc),
                               lambda p, j: (0, 0, p * tiles_per_part + j))],
        out_specs=pl.BlockSpec((1, M, F), lambda p, j: (p, 0, 0)),
        scratch_shapes=[pltpu.VMEM((M, F), jnp.float32)],
        compiler_params=pltpu.CompilerParams(
            dimension_semantics=("parallel", "arbitrary"),
            vmem_limit_bytes=cap),
    )(xg)
    return jnp.sum(stats_out, axis=0)                                # (M, F)


# ---------------------------------------------------------------------------
# Public wrapper.
# ---------------------------------------------------------------------------
def minibatch_std_layer(x, group_size, num_channels=1, *,
                        _fused_budget=None, _block_budget=None):
    """JAX/Pallas equivalent of MinibatchStdLayer.forward. x: (N, C, H, W)."""
    N, C, H, W = x.shape
    G = int(min(group_size, N)) if group_size is not None else int(N)
    F = int(num_channels)
    if N % G != 0:
        raise ValueError(f"batch size {N} must be divisible by group size {G}")
    if C % F != 0:
        raise ValueError(f"channels {C} must be divisible by num_channels {F}")
    c = C // F
    M = N // G
    HW = H * W
    CHW = C * HW
    cHW = c * HW
    FHW = F * HW
    out_cols = (C + F) * HW
    itemsize = x.dtype.itemsize

    cap = _vmem_cap_bytes()
    fused_budget = cap // 3 if _fused_budget is None else int(_fused_budget)
    block_budget = (min(cap // 8, 8 * 2**20) if _block_budget is None
                    else int(_block_budget))
    inv_G = 1.0 / G
    inv_cHW = 1.0 / cHW

    # ---- Path A: single fused kernel (x resident in VMEM, read once). ------
    est = N * CHW * itemsize + 4 * M * CHW * 4 + N * FHW * 4
    if est <= fused_budget:
        x2d = x.reshape(N, CHW)                        # free, lane-dense view
        bn = _pick_bn(N, out_cols * itemsize, min(block_budget, 4 * 2**20))
        if bn is None:
            bn = 8 if N % 8 == 0 else N
        out_flat = pl.pallas_call(
            functools.partial(_fused_kernel, G=G, M=M, F=F, HW=HW, cHW=cHW,
                              CHW=CHW, bn=bn, inv_G=inv_G, inv_cHW=inv_cHW),
            out_shape=jax.ShapeDtypeStruct((N, out_cols), x.dtype),
            grid=(N // bn,),
            in_specs=[pl.BlockSpec((N, CHW), lambda i: (0, 0))],
            out_specs=pl.BlockSpec((bn, out_cols), lambda i: (i, 0)),
            scratch_shapes=[pltpu.VMEM((N, FHW), jnp.float32)],
            compiler_params=pltpu.CompilerParams(
                dimension_semantics=("arbitrary",),
                vmem_limit_bytes=cap),
        )(x2d)
        return out_flat.reshape(N, C + F, H, W)

    # ---- Path B: two-pass (column-tiled stats, then fused concat). ---------
    stat = _stats_pallas(x, G, M, F, cHW, CHW, inv_G, inv_cHW, cap)  # (M, F)

    bn = _pick_bn(N, (CHW + out_cols) * itemsize, block_budget, want_multi=True)
    if bn is None:
        # Path C: a single 8-row slab of x exceeds the VMEM block budget.
        # Keep the Pallas stats kernel; do the (bandwidth-bound) copy in XLA.
        y = jnp.broadcast_to(stat[None, :, :, None], (G, M, F, HW))
        y = y.reshape(N, F, H, W).astype(x.dtype)
        return jnp.concatenate([x, y], axis=1)

    x2d = x.reshape(N, CHW)
    onehot = jnp.asarray(np.tile(np.eye(M, dtype=np.float32), (G, 1)))  # (N, M)
    out_flat = pl.pallas_call(
        functools.partial(_concat_kernel, M=M, F=F, HW=HW, CHW=CHW, bn=bn),
        out_shape=jax.ShapeDtypeStruct((N, out_cols), x.dtype),
        grid=(N // bn,),
        in_specs=[pl.BlockSpec((bn, CHW), lambda i: (i, 0)),
                  pl.BlockSpec((bn, M), lambda i: (i, 0)),
                  pl.BlockSpec((M, F), lambda i: (0, 0))],
        out_specs=pl.BlockSpec((bn, out_cols), lambda i: (i, 0)),
        compiler_params=pltpu.CompilerParams(
            dimension_semantics=("parallel",),
            vmem_limit_bytes=cap),
    )(x2d, onehot, stat)
    return out_flat.reshape(N, C + F, H, W)


# ---------------------------------------------------------------------------
# Pure-JAX reference mirroring the PyTorch module.
# ---------------------------------------------------------------------------
def _reference(x, group_size, num_channels=1):
    N, C, H, W = x.shape
    G = int(min(group_size, N)) if group_size is not None else N
    F = num_channels
    c = C // F
    y = x.reshape(G, -1, F, c, H, W)
    y = y - jnp.mean(y, axis=0)
    y = jnp.mean(jnp.square(y), axis=0)
    y = jnp.sqrt(y + 1e-8)
    y = jnp.mean(y, axis=(2, 3, 4))
    y = y.reshape(-1, F, 1, 1)
    y = jnp.tile(y, (G, 1, H, W))
    return jnp.concatenate([x, y], axis=1)


if __name__ == "__main__":
    key = jax.random.PRNGKey(0)
    cases = [
        # (N, C, H, W, group_size, num_channels, kwargs)
        (8, 4, 16, 16, 4, 1, {}),                      # fused path
        (8, 32, 16, 16, 4, 2, {}),                     # fused, F=2 features
        (4, 8, 8, 8, None, 1, {}),                     # fused, G=N, M=1
        (16, 8, 16, 16, 4, 1, {"_fused_budget": 0}),   # two-pass Pallas path
        (8, 8, 8, 8, None, 1, {"_fused_budget": 0}),   # two-pass, M=1 select
        (8, 4, 16, 16, 4, 1, {"_fused_budget": 0, "_block_budget": 1}),  # stats + XLA concat
    ]
    for (N, C, H, W, gs, F, kw) in cases:
        key, sub = jax.random.split(key)
        x = jax.random.normal(sub, (N, C, H, W), dtype=jnp.float32)
        out = jax.block_until_ready(minibatch_std_layer(x, gs, F, **kw))
        ref = _reference(x, gs, F)
        assert out.shape == (N, C + F, H, W)
        np.testing.assert_allclose(np.asarray(out), np.asarray(ref),
                                   rtol=1e-4, atol=1e-5)
    print("KERNEL_OK")
</pallas_src>

<mosaic_0001>
module attributes {stable_mosaic.version = 11 : i64} {
  func.func @_fused_kernel(%arg0: i32, %arg1: memref<8x1024xf32, #tpu.memory_space<vmem>>, %arg2: memref<8x1280xf32, #tpu.memory_space<vmem>>, %arg3: memref<8x256xf32, #tpu.memory_space<vmem>>) attributes {dimension_semantics = [#tpu.dimension_semantics<arbitrary>], iteration_bounds = array<i64: 1>, scalar_prefetch = 0 : i64, scratch_operands = 1 : i64, tpu.core_type = #tpu.core_type<tc>, window_params = [{pipeline_mode = #tpu.pipeline_mode<synchronous>, transform_indices = @transform_0, window_bounds = array<i64: 8, 1024>}, {transform_indices = @transform_1, window_bounds = array<i64: 8, 1280>}]} {
    %c0_i32 = arith.constant 0 : i32
    %0 = arith.cmpi eq, %arg0, %c0_i32 : i32
    %1 = arith.extui %0 : i1 to i32
    %c0_i32_0 = arith.constant 0 : i32
    %2 = arith.cmpi ne, %1, %c0_i32_0 : i32
    scf.if %2 {
      %cst = arith.constant 0.000000e+00 : f32
      %11 = vector.broadcast %cst : f32 to vector<2x1024xf32>
      %c0_5 = arith.constant 0 : index
      %c0_6 = arith.constant 0 : index
      %12 = vector.load %arg1[%c0_5, %c0_6] : memref<8x1024xf32, #tpu.memory_space<vmem>>, vector<2x1024xf32>
      %13 = arith.addf %11, %12 : vector<2x1024xf32>
      %14 = arith.mulf %12, %12 : vector<2x1024xf32>
      %15 = arith.addf %11, %14 : vector<2x1024xf32>
      %c2 = arith.constant 2 : index
      %c0_7 = arith.constant 0 : index
      %16 = vector.load %arg1[%c2, %c0_7] : memref<8x1024xf32, #tpu.memory_space<vmem>>, vector<2x1024xf32>
      %17 = arith.addf %13, %16 : vector<2x1024xf32>
      %18 = arith.mulf %16, %16 : vector<2x1024xf32>
      %19 = arith.addf %15, %18 : vector<2x1024xf32>
      %c4 = arith.constant 4 : index
      %c0_8 = arith.constant 0 : index
      %20 = vector.load %arg1[%c4, %c0_8] : memref<8x1024xf32, #tpu.memory_space<vmem>>, vector<2x1024xf32>
      %21 = arith.addf %17, %20 : vector<2x1024xf32>
      %22 = arith.mulf %20, %20 : vector<2x1024xf32>
      %23 = arith.addf %19, %22 : vector<2x1024xf32>
      %c6 = arith.constant 6 : index
      %c0_9 = arith.constant 0 : index
      %24 = vector.load %arg1[%c6, %c0_9] : memref<8x1024xf32, #tpu.memory_space<vmem>>, vector<2x1024xf32>
      %25 = arith.addf %21, %24 : vector<2x1024xf32>
      %26 = arith.mulf %24, %24 : vector<2x1024xf32>
      %27 = arith.addf %23, %26 : vector<2x1024xf32>
      %cst_10 = arith.constant 2.500000e-01 : f32
      %28 = vector.broadcast %cst_10 : f32 to vector<2x1024xf32>
      %29 = arith.mulf %25, %28 : vector<2x1024xf32>
      %cst_11 = arith.constant 2.500000e-01 : f32
      %30 = vector.broadcast %cst_11 : f32 to vector<2x1024xf32>
      %31 = arith.mulf %27, %30 : vector<2x1024xf32>
      %32 = arith.mulf %29, %29 : vector<2x1024xf32>
      %33 = arith.subf %31, %32 : vector<2x1024xf32>
      %cst_12 = arith.constant 0.000000e+00 : f32
      %34 = vector.broadcast %cst_12 : f32 to vector<2x1024xf32>
      %35 = arith.maximumf %33, %34 : vector<2x1024xf32>
      %cst_13 = arith.constant 9.99999993E-9 : f32
      %36 = vector.broadcast %cst_13 : f32 to vector<2x1024xf32>
      %37 = arith.addf %35, %36 : vector<2x1024xf32>
      %38 = math.sqrt %37 : vector<2x1024xf32>
      %cst_14 = arith.constant dense<0.000000e+00> : vector<2xf32>
      %39 = vector.multi_reduction <add>, %38, %cst_14 [1] : vector<2x1024xf32> to vector<2xf32>
      %40 = vector.shape_cast %39 : vector<2xf32> to vector<2x1xf32>
      %cst_15 = arith.constant 9.765625E-4 : f32
      %41 = vector.broadcast %cst_15 : f32 to vector<2x1xf32>
      %42 = arith.mulf %40, %41 : vector<2x1xf32>
      %43 = vector.shape_cast %42 : vector<2x1xf32> to vector<2x1xf32>
      %44 = vector.broadcast %43 : vector<2x1xf32> to vector<2x256xf32>
      %c0_16 = arith.constant 0 : index
      %c0_17 = arith.constant 0 : index
      %45 = vector.load %arg3[%c0_16, %c0_17] : memref<8x256xf32, #tpu.memory_space<vmem>>, vector<2x256xf32>
      tpu.vector_store %arg3[%c0_16, %c0_17], %44 {strides = array<i32>} : memref<8x256xf32, #tpu.memory_space<vmem>>, vector<2x256xf32>,
      %c2_18 = arith.constant 2 : index
      %c0_19 = arith.constant 0 : index
      %46 = vector.load %arg3[%c2_18, %c0_19] : memref<8x256xf32, #tpu.memory_space<vmem>>, vector<2x256xf32>
      tpu.vector_store %arg3[%c2_18, %c0_19], %44 {strides = array<i32>} : memref<8x256xf32, #tpu.memory_space<vmem>>, vector<2x256xf32>,
      %c4_20 = arith.constant 4 : index
      %c0_21 = arith.constant 0 : index
      %47 = vector.load %arg3[%c4_20, %c0_21] : memref<8x256xf32, #tpu.memory_space<vmem>>, vector<2x256xf32>
      tpu.vector_store %arg3[%c4_20, %c0_21], %44 {strides = array<i32>} : memref<8x256xf32, #tpu.memory_space<vmem>>, vector<2x256xf32>,
      %c6_22 = arith.constant 6 : index
      %c0_23 = arith.constant 0 : index
      %48 = vector.load %arg3[%c6_22, %c0_23] : memref<8x256xf32, #tpu.memory_space<vmem>>, vector<2x256xf32>
      tpu.vector_store %arg3[%c6_22, %c0_23], %44 {strides = array<i32>} : memref<8x256xf32, #tpu.memory_space<vmem>>, vector<2x256xf32>,
    } else {
    }
    %c8_i32 = arith.constant 8 : i32
    %3 = arith.muli %arg0, %c8_i32 : i32
    %4 = tpu.assume_multiple %3, 8 : i32
    %5 = arith.index_cast %4 : i32 to index
    %c0 = arith.constant 0 : index
    %6 = vector.load %arg1[%5, %c0] : memref<8x1024xf32, #tpu.memory_space<vmem>>, vector<8x1024xf32>
    %c0_1 = arith.constant 0 : index
    %c0_2 = arith.constant 0 : index
    %7 = vector.load %arg2[%c0_1, %c0_2] : memref<8x1280xf32, #tpu.memory_space<vmem>>, vector<8x1024xf32>
    tpu.vector_store %arg2[%c0_1, %c0_2], %6 {strides = array<i32>} : memref<8x1280xf32, #tpu.memory_space<vmem>>, vector<8x1024xf32>,
    %8 = arith.index_cast %4 : i32 to index
    %c0_3 = arith.constant 0 : index
    %9 = vector.load %arg3[%8, %c0_3] : memref<8x256xf32, #tpu.memory_space<vmem>>, vector<8x256xf32>
    %c0_4 = arith.constant 0 : index
    %c1024 = arith.constant 1024 : index
    %10 = vector.load %arg2[%c0_4, %c1024] : memref<8x1280xf32, #tpu.memory_space<vmem>>, vector<8x256xf32>
    tpu.vector_store %arg2[%c0_4, %c1024], %9 {strides = array<i32>} : memref<8x1280xf32, #tpu.memory_space<vmem>>, vector<8x256xf32>,
    return
  }
  func.func @transform_0(%arg0: i32) -> (i32, i32) {
    %c0_i32 = arith.constant 0 : i32
    %c0_i32_0 = arith.constant 0 : i32
    %c0_i32_1 = arith.constant 0 : i32
    return %c0_i32, %c0_i32_0 : i32, i32
  }
  func.func @transform_1(%arg0: i32) -> (i32, i32) {
    %c0_i32 = arith.constant 0 : i32
    %c0_i32_0 = arith.constant 0 : i32
    return %arg0, %c0_i32 : i32, i32
  }
}

</mosaic_0001>

<bundles_post_ra>
// kernel: tpu_custom_call.1
= control target key start
LH: loop header
LB: loop body
LE: loop exit
PB: predicated region body
PF: predicated region fallthrough
CT: control target
= control target key end

     0   :  { %6 = vsyncpa [#allocation4], 0  ;;  %s647_s0 = inlined_call_operand.hbm [shape: f32[8,1024], index: 0, kind: input, shape index: {}]   ;;  %s648_s1 = inlined_call_operand.hbm [shape: f32[8,1280], index: 1, kind: output, shape index: {}]  }
   0x1   :  { %7 = vsyncpa [#allocation5], 0  ;;  %s549_s6 = smov [#allocation3]   ;;  %s501_s10 = scalar_lea.hbm %s647_s0, 1024 }
   0x2   :  { %s14_s7 = sshll.u32 %s549_s6, 4  ;;  %p502_p0 = scmp.ne.s32.totalorder %s647_s0, %s501_s10  ;;  %s15_s7 = int_to_ptr.vmem [resolvable:$true] %s14_s7 }
   0x3   :  { %p505_p1 = scmp.lt.u32.totalorder %s501_s10, %s647_s0 }
   0x5   :  { %p507_p2 = pnand %p505_p1, %p502_p0 }
   0x7   :  { %510 = shalt.err (!%p507_p2)
}
   0x8   :  { %s511_s15 = scalar_lea.vmem %s15_s7, 1024  ;;  %p516_p4 = scmp.lt.s32.totalorder %s15_s7, %s15_s7 }
   0x9   :  { %p512_p3 = scmp.ne.s32.totalorder %s15_s7, %s511_s15  ;;  %p517_p5 = scmp.lt.s32.totalorder %s511_s15, %s511_s15 }
   0xb   :  { %p518_p6 = por %p517_p5, %p516_p4 }
   0xd   :  { %p519_p7 = pnand %p518_p6, %p512_p3 }
   0xf   :  { %522 = shalt.err (!%p519_p7)
}
  0x10   :  { %17 = dma.hbm_to_vmem [thread:$0]  %s647_s0, 1024, %s15_s7, [#allocation4]  }
  0x11   :  { %545 = dma.done.wait [#allocation4], 1024  }
  0x12   :  { %546 = vsyncadd [#allocation4], 4294966272  ;;  %v25_v0 = vld [vmem:[#allocation3] sm:$0x3]  ;;  %v26_v1 = vld [vmem:[#allocation3 + $0x8] sm:$0x3] }
  0x13   :  { %v27_v2 = vld [vmem:[#allocation3 + $0x10] sm:$0x3]  ;;  %v28_v3 = vld [vmem:[#allocation3 + $0x18] sm:$0x3]  ;;  %v29_v4 = vld [vmem:[#allocation3 + $0x20] sm:$0x3]  ;;  %v41_v8 = vmul.f32 %v25_v0, %v25_v0  ;;  %v42_v9 = vmul.f32 %v26_v1, %v26_v1 }
  0x14   :  { %v30_v5 = vld [vmem:[#allocation3 + $0x28] sm:$0x3]  ;;  %v31_v6 = vld [vmem:[#allocation3 + $0x30] sm:$0x3]  ;;  %v32_v7 = vld [vmem:[#allocation3 + $0x38] sm:$0x3]  ;;  %v43_v10 = vmul.f32 %v27_v2, %v27_v2  ;;  %v44_v11 = vmul.f32 %v28_v3, %v28_v3  ;;  %v45_v13 = vmul.f32 %v29_v4, %v29_v4 }
  0x15   :  { %v57_v12 = vld [vmem:[#allocation3] sm:$0xc]  ;;  %v46_v14 = vmul.f32 %v30_v5, %v30_v5  ;;  %v47_v15 = vmul.f32 %v31_v6, %v31_v6  ;;  %v48_v16 = vmul.f32 %v32_v7, %v32_v7  ;;  %v58_v17 = vld [vmem:[#allocation3 + $0x8] sm:$0xc]  ;;  %v59_v18 = vld [vmem:[#allocation3 + $0x10] sm:$0xc] }
  0x16   :  { %v60_v19 = vld [vmem:[#allocation3 + $0x18] sm:$0xc]  ;;  %v61_v20 = vld [vmem:[#allocation3 + $0x20] sm:$0xc]  ;;  %v62_v21 = vld [vmem:[#allocation3 + $0x28] sm:$0xc]  ;;  %v97_v23 = vmul.f32 %v57_v12, %v57_v12  ;;  %v98_v24 = vmul.f32 %v58_v17, %v58_v17  ;;  %v99_v25 = vmul.f32 %v59_v18, %v59_v18 }
  0x17   :  { %v63_v22 = vld [vmem:[#allocation3 + $0x30] sm:$0xc]  ;;  %v100_v26 = vmul.f32 %v60_v19, %v60_v19  ;;  %v64_v27 = vld [vmem:[#allocation3 + $0x38] sm:$0xc]  ;;  %v73_v28 = vrot.slane %v57_v12, 2  ;;  %v74_v29 = vrot.slane %v58_v17, 2  ;;  %v101_v44 = vmul.f32 %v61_v20, %v61_v20 }
  0x18   :  { %v75_v30 = vrot.slane %v59_v18, 2  ;;  %v76_v31 = vrot.slane %v60_v19, 2  ;;  %v77_v32 = vrot.slane %v61_v20, 2  ;;  %v78_v33 = vrot.slane %v62_v21, 2  ;;  %v137_v48 = vld [vmem:[#allocation3] sm:$0x30] }
  0x19   :  { %v79_v34 = vrot.slane %v63_v22, 2  ;;  %v80_v35 = vrot.slane %v64_v27, 2  ;;  %v89_v36 = vadd.f32 %v73_v28, %v25_v0  ;;  %v90_v37 = vadd.f32 %v74_v29, %v26_v1  ;;  %v138_v49 = vld [vmem:[#allocation3 + $0x8] sm:$0x30]  ;;  %v139_v50 = vld [vmem:[#allocation3 + $0x10] sm:$0x30] }
  0x1a   :  { %v91_v38 = vadd.f32 %v75_v30, %v27_v2  ;;  %v92_v39 = vadd.f32 %v76_v31, %v28_v3  ;;  %v93_v40 = vadd.f32 %v77_v32, %v29_v4  ;;  %v94_v41 = vadd.f32 %v78_v33, %v30_v5  ;;  %v140_v55 = vld [vmem:[#allocation3 + $0x18] sm:$0x30]  ;;  %v141_v60 = vld [vmem:[#allocation3 + $0x20] sm:$0x30]  ;;  %v142_v1 = vld [vmem:[#allocation3 + $0x28] sm:$0x30] }
  0x1b   :  { %v95_v42 = vadd.f32 %v79_v34, %v31_v6  ;;  %v96_v43 = vadd.f32 %v80_v35, %v32_v7  ;;  %v102_v45 = vmul.f32 %v62_v21, %v62_v21  ;;  %v103_v46 = vmul.f32 %v63_v22, %v63_v22  ;;  %v143_v2 = vld [vmem:[#allocation3 + $0x30] sm:$0x30]  ;;  %v144_v3 = vld [vmem:[#allocation3 + $0x38] sm:$0x30]  ;;  %v217_v32 = vld [vmem:[#allocation3] sm:$0xc0] }
  0x1c   :  { %v104_v47 = vmul.f32 %v64_v27, %v64_v27  ;;  %v113_v51 = vrot.slane %v97_v23, 2  ;;  %v114_v52 = vrot.slane %v98_v24, 2  ;;  %v115_v53 = vrot.slane %v99_v25, 2  ;;  %v218_v33 = vld [vmem:[#allocation3 + $0x8] sm:$0xc0]  ;;  %s550_s0 = smov [#allocation6]  }
  0x1d   :  { %v116_v54 = vrot.slane %v100_v26, 2  ;;  %v117_v56 = vrot.slane %v101_v44, 2  ;;  %v118_v57 = vrot.slane %v102_v45, 2  ;;  %v119_v58 = vrot.slane %v103_v46, 2  ;;  %v219_v34 = vld [vmem:[#allocation3 + $0x10] sm:$0xc0] }
  0x1e   :  { %v120_v59 = vrot.slane %v104_v47, 2  ;;  %v129_v61 = vadd.f32 %v113_v51, %v41_v8  ;;  %v130_v62 = vadd.f32 %v114_v52, %v42_v9  ;;  %v131_v63 = vadd.f32 %v115_v53, %v43_v10  ;;  %v221_v44 = vld [vmem:[#allocation3 + $0x20] sm:$0xc0]  ;;  %v224_v51 = vld [vmem:[#allocation3 + $0x38] sm:$0xc0]  ;;  %s470_s18 = sshll.u32 %s550_s0, 4  ;;  %s471_s18 = int_to_ptr.vmem [resolvable:$true] %s470_s18 }
  0x1f   :  { %v132_v0 = vadd.f32 %v116_v54, %v44_v11  ;;  %v133_v4 = vadd.f32 %v117_v56, %v45_v13  ;;  %v134_v5 = vadd.f32 %v118_v57, %v46_v14  ;;  %v135_v6 = vadd.f32 %v119_v58, %v47_v15  ;;  %s523_s19 = scalar_lea.vmem %s471_s18, 1280  ;;  %p528_p9 = scmp.lt.s32.totalorder %s471_s18, %s471_s18 }
  0x20   :  { %v136_v7 = vadd.f32 %v120_v59, %v48_v16  ;;  %v153_v12 = vrot.slane %v137_v48, 4  ;;  %v154_v17 = vrot.slane %v138_v49, 4  ;;  %v155_v18 = vrot.slane %v139_v50, 4  ;;  %p524_p8 = scmp.ne.s32.totalorder %s471_s18, %s523_s19  ;;  %p529_p10 = scmp.lt.s32.totalorder %s523_s19, %s523_s19 }
  0x21   :  { %v156_v19 = vrot.slane %v140_v55, 4  ;;  %v157_v20 = vrot.slane %v141_v60, 4  ;;  %v158_v21 = vrot.slane %v142_v1, 4  ;;  %v159_v22 = vrot.slane %v143_v2, 4 }
  0x22   :  { %v160_v23 = vrot.slane %v144_v3, 4  ;;  %v169_v24 = vadd.f32 %v153_v12, %v89_v36  ;;  %v170_v8 = vadd.f32 %v154_v17, %v90_v37  ;;  %v171_v9 = vadd.f32 %v155_v18, %v91_v38  ;;  %p530_p11 = por %p529_p10, %p528_p9 }
  0x23   :  { %v172_v10 = vadd.f32 %v156_v19, %v92_v39  ;;  %v173_v11 = vadd.f32 %v157_v20, %v93_v40  ;;  %v174_v25 = vadd.f32 %v158_v21, %v94_v41  ;;  %v175_v26 = vadd.f32 %v159_v22, %v95_v42  ;;  %v220_v39 = vld [vmem:[#allocation3 + $0x18] sm:$0xc0] }
  0x24   :  { %v176_v27 = vadd.f32 %v160_v23, %v96_v43  ;;  %v177_v13 = vmul.f32 %v137_v48, %v137_v48  ;;  %v178_v14 = vmul.f32 %v138_v49, %v138_v49  ;;  %v179_v15 = vmul.f32 %v139_v50, %v139_v50  ;;  %v222_v49 = vld [vmem:[#allocation3 + $0x28] sm:$0xc0]  ;;  %v223_v50 = vld [vmem:[#allocation3 + $0x30] sm:$0xc0]  ;;  %p531_p12 = pnand %p530_p11, %p524_p8 }
  0x25   :  { %v180_v16 = vmul.f32 %v140_v55, %v140_v55  ;;  %v181_v28 = vmul.f32 %v141_v60, %v141_v60  ;;  %v182_v29 = vmul.f32 %v142_v1, %v142_v1  ;;  %v183_v30 = vmul.f32 %v143_v2, %v143_v2 }
  0x26   :  { %v184_v31 = vmul.f32 %v144_v3, %v144_v3  ;;  %v193_v35 = vrot.slane %v177_v13, 4  ;;  %v194_v36 = vrot.slane %v178_v14, 4  ;;  %v195_v37 = vrot.slane %v179_v15, 4 }
  0x27   :  { %v196_v38 = vrot.slane %v180_v16, 4  ;;  %v197_v40 = vrot.slane %v181_v28, 4  ;;  %v198_v41 = vrot.slane %v182_v29, 4  ;;  %v199_v42 = vrot.slane %v183_v30, 4 }
  0x28   :  { %v200_v43 = vrot.slane %v184_v31, 4  ;;  %v209_v45 = vadd.f32 %v193_v35, %v129_v61  ;;  %v210_v46 = vadd.f32 %v194_v36, %v130_v62  ;;  %v211_v47 = vadd.f32 %v195_v37, %v131_v63 }
  0x29   :  { %v212_v48 = vadd.f32 %v196_v38, %v132_v0  ;;  %v213_v52 = vadd.f32 %v197_v40, %v133_v4  ;;  %v214_v53 = vadd.f32 %v198_v41, %v134_v5  ;;  %v215_v54 = vadd.f32 %v199_v42, %v135_v6 }
  0x2a   :  { %v216_v55 = vadd.f32 %v200_v43, %v136_v7  ;;  %v233_v56 = vrot.slane %v217_v32, 6  ;;  %v234_v57 = vrot.slane %v218_v33, 6  ;;  %v235_v58 = vrot.slane %v219_v34, 6 }
  0x2b   :  { %v236_v59 = vrot.slane %v220_v39, 6  ;;  %v237_v60 = vrot.slane %v221_v44, 6  ;;  %v238_v1 = vrot.slane %v222_v49, 6  ;;  %v239_v2 = vrot.slane %v223_v50, 6 }
  0x2c   :  { %v240_v3 = vrot.slane %v224_v51, 6  ;;  %v249_v12 = vadd.f32 %v233_v56, %v169_v24  ;;  %v250_v61 = vadd.f32 %v234_v57, %v170_v8  ;;  %v251_v62 = vadd.f32 %v235_v58, %v171_v9 }
  0x2d   :  { %v252_v63 = vadd.f32 %v236_v59, %v172_v10  ;;  %v253_v0 = vadd.f32 %v237_v60, %v173_v11  ;;  %v254_v17 = vadd.f32 %v238_v1, %v174_v25  ;;  %v255_v18 = vadd.f32 %v239_v2, %v175_v26 }
  0x2e   :  { %v256_v19 = vadd.f32 %v240_v3, %v176_v27  ;;  %v257_v4 = vmul.f32 %v217_v32, %v217_v32  ;;  %v258_v5 = vmul.f32 %v218_v33, %v218_v33  ;;  %v259_v6 = vmul.f32 %v219_v34, %v219_v34 }
  0x2f   :  { %v260_v7 = vmul.f32 %v220_v39, %v220_v39  ;;  %v261_v20 = vmul.f32 %v221_v44, %v221_v44  ;;  %v262_v21 = vmul.f32 %v222_v49, %v222_v49  ;;  %v263_v22 = vmul.f32 %v223_v50, %v223_v50 }
  0x30   :  { %v264_v23 = vmul.f32 %v224_v51, %v224_v51  ;;  %v273_v13 = vrot.slane %v257_v4, 6  ;;  %v274_v14 = vrot.slane %v258_v5, 6  ;;  %v275_v15 = vrot.slane %v259_v6, 6 }
  0x31   :  { %v276_v16 = vrot.slane %v260_v7, 6  ;;  %v277_v24 = vrot.slane %v261_v20, 6  ;;  %v278_v8 = vrot.slane %v262_v21, 6  ;;  %v279_v9 = vrot.slane %v263_v22, 6 }
  0x32   :  { %v280_v10 = vrot.slane %v264_v23, 6  ;;  %v289_v11 = vadd.f32 %v273_v13, %v209_v45  ;;  %v290_v25 = vadd.f32 %v274_v14, %v210_v46  ;;  %v291_v26 = vadd.f32 %v275_v15, %v211_v47 }
  0x33   :  { %v292_v27 = vadd.f32 %v276_v16, %v212_v48  ;;  %v293_v28 = vadd.f32 %v277_v24, %v213_v52  ;;  %v294_v29 = vadd.f32 %v278_v8, %v214_v53  ;;  %v295_v30 = vadd.f32 %v279_v9, %v215_v54 }
  0x34   :  { %v296_v31 = vadd.f32 %v280_v10, %v216_v55  ;;  %v297_v32 = vmul.f32 0.25, %v249_v12  ;;  %v298_v33 = vmul.f32 0.25, %v250_v61  ;;  %v299_v34 = vmul.f32 0.25, %v251_v62 }
  0x35   :  { %v300_v35 = vmul.f32 0.25, %v252_v63  ;;  %v301_v36 = vmul.f32 0.25, %v253_v0  ;;  %v302_v37 = vmul.f32 0.25, %v254_v17  ;;  %v303_v38 = vmul.f32 0.25, %v255_v18 }
  0x36   :  { %v304_v39 = vmul.f32 0.25, %v256_v19  ;;  %v305_v40 = vmul.f32 0.25, %v289_v11  ;;  %v306_v41 = vmul.f32 0.25, %v290_v25  ;;  %v307_v42 = vmul.f32 0.25, %v291_v26 }
  0x37   :  { %v308_v43 = vmul.f32 0.25, %v292_v27  ;;  %v309_v44 = vmul.f32 0.25, %v293_v28  ;;  %v310_v45 = vmul.f32 0.25, %v294_v29  ;;  %v311_v46 = vmul.f32 0.25, %v295_v30 }
  0x38   :  { %v312_v47 = vmul.f32 0.25, %v296_v31  ;;  %v313_v48 = vmul.f32 %v297_v32, %v297_v32  ;;  %v314_v49 = vmul.f32 %v298_v33, %v298_v33  ;;  %v315_v50 = vmul.f32 %v299_v34, %v299_v34 }
  0x39   :  { %v316_v51 = vmul.f32 %v300_v35, %v300_v35  ;;  %v317_v52 = vmul.f32 %v301_v36, %v301_v36  ;;  %v318_v53 = vmul.f32 %v302_v37, %v302_v37  ;;  %v319_v54 = vmul.f32 %v303_v38, %v303_v38 }
  0x3a   :  { %v320_v55 = vmul.f32 %v304_v39, %v304_v39  ;;  %v321_v56 = vsub.f32 %v305_v40, %v313_v48  ;;  %v322_v57 = vsub.f32 %v306_v41, %v314_v49  ;;  %v323_v58 = vsub.f32 %v307_v42, %v315_v50 }
  0x3b   :  { %v324_v59 = vsub.f32 %v308_v43, %v316_v51  ;;  %v325_v60 = vsub.f32 %v309_v44, %v317_v52  ;;  %v326_v1 = vsub.f32 %v310_v45, %v318_v53  ;;  %v327_v2 = vsub.f32 %v311_v46, %v319_v54 }
  0x3c   :  { %v328_v3 = vsub.f32 %v312_v47, %v320_v55  ;;  %v329_v12 = vmax.f32 %v321_v56, 0.0  ;;  %v330_v61 = vmax.f32 %v322_v57, 0.0  ;;  %v331_v62 = vmax.f32 %v323_v58, 0.0 }
  0x3d   :  { %v332_v63 = vmax.f32 %v324_v59, 0.0  ;;  %v333_v0 = vmax.f32 %v325_v60, 0.0  ;;  %v334_v17 = vmax.f32 %v326_v1, 0.0  ;;  %v335_v18 = vmax.f32 %v327_v2, 0.0 }
  0x3e   :  { %v337_v19 = vadd.f32 1e-08, %v329_v12  ;;  %v338_v4 = vadd.f32 1e-08, %v330_v61  ;;  %v339_v5 = vadd.f32 1e-08, %v331_v62 }
  0x3f   :  { %v336_v6 = vmax.f32 %v328_v3, 0.0  ;;  %v340_v7 = vadd.f32 1e-08, %v332_v63  ;;  %v573_v20 = vadd.f32 1e-08, %v333_v0  ;;  %vm401_vm2 = vcmask 1041408  }
  0x40   :  { %485 = vrsqrt.f32 %v337_v19  ;;  %v575_v21 = vadd.f32 1e-08, %v334_v17  ;;  %v577_v22 = vadd.f32 1e-08, %v335_v18  ;;  %vm347_vm0 = vcmp.eq.f32.partialorder %v337_v19, inf }
  0x41   :  { %487 = vrsqrt.f32 %v338_v4  ;;  %v579_v23 = vadd.f32 1e-08, %v336_v6  ;;  %vm349_vm1 = vcmp.eq.f32.partialorder %v337_v19, 0.0  ;;  %v350_v13 = vand.u32 2147483648, %v337_v19  ;;  %v444_v6 = vld [vmem:[#allocation3 + $0x18] sm:$0xff] }
  0x42   :  { %489 = vrsqrt.f32 %v339_v5  ;;  %vm354_vm3 = vcmp.eq.f32.partialorder %v338_v4, inf  ;;  %vm356_vm4 = vcmp.eq.f32.partialorder %v338_v4, 0.0  ;;  %v357_v14 = vand.u32 2147483648, %v338_v4  ;;  %452 = vst [vmem:[#allocation6 + $0x18] sm:$0xff] %v444_v6 }
  0x43   :  { %491 = vrsqrt.f32 %v340_v7  ;;  %vm361_vm5 = vcmp.eq.f32.partialorder %v339_v5, inf  ;;  %vm363_vm6 = vcmp.eq.f32.partialorder %v339_v5, 0.0  ;;  %v364_v15 = vand.u32 2147483648, %v339_v5 }
  0x44   :  { %493 = vrsqrt.f32 %v573_v20  ;;  %vm368_vm7 = vcmp.eq.f32.partialorder %v340_v7, inf  ;;  %vm370_vm8 = vcmp.eq.f32.partialorder %v340_v7, 0.0  ;;  %v371_v24 = vand.u32 2147483648, %v340_v7 }
  0x45   :  { %495 = vrsqrt.f32 %v575_v21  ;;  %vm375_vm9 = vcmp.eq.f32.partialorder %v573_v20, inf  ;;  %vm377_vm10 = vcmp.eq.f32.partialorder %v573_v20, 0.0  ;;  %v378_v10 = vand.u32 2147483648, %v573_v20 }
  0x46   :  { %497 = vrsqrt.f32 %v577_v22  ;;  %vm382_vm11 = vcmp.eq.f32.partialorder %v575_v21, inf  ;;  %vm384_vm12 = vcmp.eq.f32.partialorder %v575_v21, 0.0  ;;  %v385_v26 = vand.u32 2147483648, %v575_v21 }
  0x47   :  { %499 = vrsqrt.f32 %v579_v23  ;;  %vm389_vm13 = vcmp.eq.f32.partialorder %v577_v22, inf  ;;  %vm391_vm14 = vcmp.eq.f32.partialorder %v577_v22, 0.0  ;;  %v392_v30 = vand.u32 2147483648, %v577_v22 }
  0x48   :  { %vm396_vm15 = vcmp.eq.f32.partialorder %v579_v23, inf  ;;  %v399_v35 = vand.u32 2147483648, %v579_v23 }
  0x4a   :  { %v486_v16 = vpop.eup %485 }
  0x4b   :  { %v488_v8 = vpop.eup %487  ;;  %v346_v9 = vmul.f32 %v486_v16, %v337_v19 }
  0x4c   :  { %v490_v11 = vpop.eup %489  ;;  %v353_v25 = vmul.f32 %v488_v8, %v338_v4 }
  0x4d   :  { %v492_v27 = vpop.eup %491  ;;  %v348_v28 = vsel %vm347_vm0, %v337_v19, %v346_v9  ;;  %v360_v29 = vmul.f32 %v490_v11, %v339_v5  ;;  %vm398_vm0 = vcmp.eq.f32.partialorder %v579_v23, 0.0  ;;  %v441_v19 = vld [vmem:[#allocation3] sm:$0xff] }
  0x4e   :  { %v494_v31 = vpop.eup %493  ;;  %v351_v32 = vsel %vm349_vm1, %v350_v13, %v348_v28  ;;  %v355_v33 = vsel %vm354_vm3, %v338_v4, %v353_v25  ;;  %v367_v34 = vmul.f32 %v492_v27, %v340_v7  ;;  %v442_v4 = vld [vmem:[#allocation3 + $0x8] sm:$0xff]  ;;  %449 = vst [vmem:[#allocation6] sm:$0xff] %v441_v19 }
  0x4f   :  { %v496_v36 = vpop.eup %495  ;;  %v358_v37 = vsel %vm356_vm4, %v357_v14, %v355_v33  ;;  %v362_v38 = vsel %vm361_vm5, %v339_v5, %v360_v29  ;;  %v374_v39 = vmul.f32 %v494_v31, %v573_v20  ;;  %v402_v40 = vsel %vm401_vm2, %v351_v32, 0.0  ;;  %v443_v5 = vld [vmem:[#allocation3 + $0x10] sm:$0xff]  ;;  %450 = vst [vmem:[#allocation6 + $0x8] sm:$0xff] %v442_v4 }
  0x50   :  { %v498_v41 = vpop.eup %497  ;;  %v365_v42 = vsel %vm363_vm6, %v364_v15, %v362_v38  ;;  %v369_v43 = vsel %vm368_vm7, %v340_v7, %v367_v34  ;;  %v381_v44 = vmul.f32 %v496_v36, %v575_v21  ;;  %v403_v45 = vsel %vm401_vm2, %v358_v37, 0.0  ;;  %v445_v7 = vld [vmem:[#allocation3 + $0x20] sm:$0xff]  ;;  %451 = vst [vmem:[#allocation6 + $0x10] sm:$0xff] %v443_v5 }
  0x51   :  { %v500_v46 = vpop.eup %499  ;;  %v372_v47 = vsel %vm370_vm8, %v371_v24, %v369_v43  ;;  %v376_v48 = vsel %vm375_vm9, %v573_v20, %v374_v39  ;;  %v388_v49 = vmul.f32 %v498_v41, %v577_v22  ;;  %v404_v50 = vadd.f32 %v403_v45, %v402_v40  ;;  %v446_v20 = vld [vmem:[#allocation3 + $0x28] sm:$0xff]  ;;  %453 = vst [vmem:[#allocation6 + $0x20] sm:$0xff] %v445_v7 }
  0x52   :  { %v379_v51 = vsel %vm377_vm10, %v378_v10, %v376_v48  ;;  %v383_v52 = vsel %vm382_vm11, %v575_v21, %v381_v44  ;;  %v395_v53 = vmul.f32 %v500_v46, %v579_v23  ;;  %v405_v54 = vsel %vm401_vm2, %v365_v42, 0.0  ;;  %v447_v21 = vld [vmem:[#allocation3 + $0x30] sm:$0xff]  ;;  %454 = vst [vmem:[#allocation6 + $0x28] sm:$0xff] %v446_v20 }
  0x53   :  { %v386_v55 = vsel %vm384_vm12, %v385_v26, %v383_v52  ;;  %v390_v56 = vsel %vm389_vm13, %v577_v22, %v388_v49  ;;  %v406_v57 = vadd.f32 %v405_v54, %v404_v50  ;;  %v407_v58 = vsel %vm401_vm2, %v372_v47, 0.0  ;;  %v448_v22 = vld [vmem:[#allocation3 + $0x38] sm:$0xff]  ;;  %455 = vst [vmem:[#allocation6 + $0x30] sm:$0xff] %v447_v21 }
  0x54   :  { %v397_v59 = vsel %vm396_vm15, %v579_v23, %v395_v53  ;;  %v409_v60 = vsel %vm401_vm2, %v379_v51, 0.0  ;;  %v393_v1 = vsel %vm391_vm14, %v392_v30, %v390_v56  ;;  %v411_v3 = vsel %vm401_vm2, %v386_v55, 0.0  ;;  %456 = vst [vmem:[#allocation6 + $0x38] sm:$0xff] %v448_v22 }
  0x55   :  { %v408_v2 = vadd.f32 %v407_v58, %v406_v57  ;;  %v400_v12 = vsel %vm398_vm0, %v399_v35, %v397_v59  ;;  %v413_v62 = vsel %vm401_vm2, %v393_v1, 0.0 }
  0x56   :  { %v415_v0 = vsel %vm401_vm2, %v400_v12, 0.0 }
  0x57   :  { %v410_v61 = vadd.f32 %v409_v60, %v408_v2 }
  0x59   :  { %v412_v63 = vadd.f32 %v411_v3, %v410_v61 }
  0x5b   :  { %v414_v17 = vadd.f32 %v413_v62, %v412_v63 }
  0x5d   :  { %v416_v18 = vadd.f32 %v415_v0, %v414_v17 }
  0x5f   :  { %417 = vadd.xlane.f32.xlu0 %v416_v18 }
  0xec   :  { %v418_v23 = vpop.xlane.xlu0 %417 }
  0xed   :  { %v419_v13 = vmul.f32 0.0009765625, %v418_v23 }
  0xef   :  { %420 = vst [vmem:[#allocation2] sm:$0x3] %v419_v13  ;;  %421 = vst [vmem:[#allocation2 + $0x8] sm:$0x3] %v419_v13  ;;  %v423_v14 = vrot.slane %v419_v13, 6  ;;  %v427_v15 = vrot.slane %v419_v13, 4 }
  0xf0   :  { %v431_v16 = vrot.slane %v419_v13, 2 }
  0xf1   :  { %425 = vst [vmem:[#allocation2] sm:$0xc] %v423_v14  ;;  %426 = vst [vmem:[#allocation2 + $0x8] sm:$0xc] %v423_v14 }
  0xf2   :  { %429 = vst [vmem:[#allocation2] sm:$0x30] %v427_v15  ;;  %430 = vst [vmem:[#allocation2 + $0x8] sm:$0x30] %v427_v15 }
  0xf3   :  { %433 = vst [vmem:[#allocation2] sm:$0xc0] %v431_v16  ;;  %434 = vst [vmem:[#allocation2 + $0x8] sm:$0xc0] %v431_v16 }
  0xfa   :  { %v460_v24 = vld [vmem:[#allocation2] sm:$0xff]  ;;  %v461_v8 = vld [vmem:[#allocation2 + $0x8] sm:$0xff] }
  0xfb   :  { %462 = vst [vmem:[#allocation6 + $0x40] sm:$0xff] %v460_v24  ;;  %463 = vst [vmem:[#allocation6 + $0x48] sm:$0xff] %v461_v8 }
  0xfc   :  { %534 = shalt.err (!%p531_p12)
}
  0xfd   :  { %s535_s22 = scalar_lea.hbm %s648_s1, 1280 }
  0xfe   :  { %p536_p13 = scmp.ne.s32.totalorder %s648_s1, %s535_s22  ;;  %p539_p0 = scmp.lt.u32.totalorder %s535_s22, %s648_s1 }
 0x100   :  { %p541_p1 = pnand %p539_p0, %p536_p13 }
 0x102   :  { %544 = shalt.err (!%p541_p1)
}
 0x103   :  { %473 = dma.vmem_to_hbm [thread:$0]  %s471_s18, 1280, %s648_s1, [#allocation5]  }
 0x104   :  { %547 = dma.done.wait [#allocation5], 1280  }
 0x105   :  { %548 = vsyncadd [#allocation5], 4294966016 }
 0x106   :  { %477 = vsyncpa [#allocation4], 1 }
 0x107   :  { %478 = vsyncpa [#allocation5], 1 }

</bundles_post_ra>
